<compile_context>
chip_gen: v7x
topology: tpu7x:2x2x1
jax: 0.10.0
libtpu: 0.0.40
codegen_flags: <defaults>
</compile_context>

<pallas_src>
import jax
import jax.numpy as jnp
from jax import lax
from jax.experimental import pallas as pl
from jax.experimental.pallas import tpu as pltpu


_VMEM_LIMIT_BYTES = 32 * 1024 * 1024   # explicit: > v5e's 16 MiB scoped default,
                                       # <= half of v7x's 64 MiB physical VMEM.
_VMEM_BUDGET_BYTES = 24 * 1024 * 1024  # NB sizing target (headroom under the limit).


def attn_layer_kernel(ctx_ref, qproj_ref, w_mix_ref, out_q_ref, out_ref, wgt_ref):
    # ctx_ref   : (NB, L, D_in)   context tile for NB batch elements (native dtype)
    # qproj_ref : (Q, D_in)       query @ W_in^T            (hoisted, batch-invariant)
    # w_mix_ref : (D_out, D_in)   linear_out weight acting on `mix`
    # out_q_ref : (Q, D_out)      q_proj @ W_out[:, D_in:]^T (hoisted, batch-invariant)
    # out_ref   : (NB, Q, D_out)  attention output (D_out lane-dense)
    # wgt_ref   : (NB, Q, L)      softmax attention weights
    nb, _, d_in = ctx_ref.shape
    q_len, d_out = out_q_ref.shape

    ctx = ctx_ref[...]          # keep native dtype for the MXU inputs (bf16-friendly)
    qp = qproj_ref[...]

    # scores[b] = q_proj @ ctx[b]^T  (contraction over D_in -> MXU-native trans_b)
    qb = jnp.broadcast_to(qp[None], (nb, q_len, d_in))
    scores = jnp.einsum('bqd,bld->bql', qb, ctx,
                        preferred_element_type=jnp.float32)            # (NB, Q, L) f32

    # softmax over the context axis; statistics stay f32 (v5e-safe).
    m = jnp.max(scores, axis=-1, keepdims=True)
    e = jnp.exp(scores - m)
    denom = jnp.sum(e, axis=-1, keepdims=True)
    # approx=True -> EUP vrcp slot (otherwise idle next to MXU/VPU work); a few e-4
    # relative error, test tolerance loosened accordingly.
    weights = e * pl.reciprocal(denom, approx=True)                    # (NB, Q, L) f32

    # mix[b] = weights[b] @ ctx[b]; cast probs to ctx dtype (flash-attn style).
    mix = jnp.einsum('bql,bld->bqd', weights.astype(ctx.dtype), ctx,
                     preferred_element_type=jnp.float32)               # (NB, Q, D_in) f32

    # Output projection as ONE flat 2-D MXU matmul:
    #   (NB*Q, D_in) x (D_out, D_in)^T   -- contraction over the last dim of both
    # operands (native trans_b path), then a cheap sublane-only reshape back.
    mix2d = mix.reshape(nb * q_len, d_in).astype(w_mix_ref.dtype)
    out2d = lax.dot_general(mix2d, w_mix_ref[...],
                            (((1,), (1,)), ((), ())),
                            preferred_element_type=jnp.float32)        # (NB*Q, D_out)
    out = out2d.reshape(nb, q_len, d_out) + out_q_ref[...].astype(jnp.float32)[None]
    out = jnp.tanh(out)                                                # ignore_tanh=False

    out_ref[...] = out.astype(out_ref.dtype)       # (NB, Q, D_out): lane-dense stores
    wgt_ref[...] = weights.astype(wgt_ref.dtype)   # (NB, Q, L)


def _pick_batch_block(n, l, d_in, q, d_out, itemsize, budget_bytes):
    """Largest batch chunk NB dividing n that (a) leaves a >=2-step grid so the
    'parallel' batch axis can shard across v7x's two TensorCores and BlockSpec
    pipelining has something to overlap, and (b) fits the per-step VMEM budget
    (double-buffered ctx + outputs, invariant operands, f32 intermediates)."""
    def vmem_estimate(nb):
        ctx = 2 * nb * l * d_in * itemsize                       # double-buffered context
        outs = 2 * nb * q * (d_out + l) * itemsize               # double-buffered outputs
        inv = 2 * (q * d_in + d_out * d_in + q * d_out) * itemsize
        tmp = (3 * nb * q * l + nb * q * d_in + nb * q * d_out) * 4  # f32 intermediates
        return ctx + outs + inv + tmp

    divisors = [d for d in range(1, n + 1) if n % d == 0]
    cands = [d for d in divisors if n // d >= 2] or [min(divisors)]
    fitting = [d for d in cands if vmem_estimate(d) <= budget_bytes]
    return max(fitting) if fitting else min(divisors)


def attn_layer_forward(context, query_param, w_in, w_out, num_query, dim_out,
                       batch_block=None):
    """context: (N, L, D_in). Returns (attn_map (N, D_out, H, W), attn_weights (N, Q, L))."""
    N, L, D_in = context.shape
    Q = num_query
    H = W = int(round(num_query ** 0.5))
    assert H * W == Q
    dt = context.dtype
    itemsize = jnp.dtype(dt).itemsize

    # ---- batch-invariant precompute (plain XLA, hoisted out of the grid) ----
    q_proj_f = jnp.dot(query_param[0], w_in.T)          # (Q, D_in)   linear_in
    out_q_f = jnp.dot(q_proj_f, w_out[:, D_in:].T)      # (Q, D_out)  query half of linear_out
    q_proj = q_proj_f.astype(dt)
    out_q = out_q_f.astype(dt)
    w_out_mix = w_out[:, :D_in].astype(dt)              # (D_out, D_in)

    # Batch chunk per grid step.
    if batch_block is None:
        NB = _pick_batch_block(N, L, D_in, Q, dim_out, itemsize, _VMEM_BUDGET_BYTES)
    else:
        NB = batch_block
    assert N % NB == 0

    # Advisory cost estimate so XLA can overlap this call with the hoisted matmuls.
    flops = 4 * N * Q * L * D_in + 2 * N * Q * D_in * dim_out
    transcendentals = N * Q * L + N * Q * dim_out + N * Q      # exp + tanh + recip
    bytes_accessed = ((N * L * D_in + N * Q * dim_out + N * Q * L)
                      + (Q * D_in + dim_out * D_in + Q * dim_out)) * itemsize
    cost = pl.CostEstimate(flops=int(flops),
                           transcendentals=int(transcendentals),
                           bytes_accessed=int(bytes_accessed))

    out_qd, attn_weights = pl.pallas_call(
        attn_layer_kernel,
        out_shape=(
            jax.ShapeDtypeStruct((N, Q, dim_out), dt),   # lane-dense D_out last
            jax.ShapeDtypeStruct((N, Q, L), dt),
        ),
        grid=(N // NB,),
        in_specs=[
            pl.BlockSpec((NB, L, D_in), lambda b: (b, 0, 0)),    # context, per batch chunk
            # Grid-invariant operands (constant index_map).  pipeline_mode=pl.Buffered(1)
            # would drop their second pipeline buffer (pure VMEM saving); kept on the
            # default here for compile robustness — they are tiny vs. ctx/outputs.
            pl.BlockSpec((Q, D_in), lambda b: (0, 0)),           # hoisted projected query
            pl.BlockSpec((dim_out, D_in), lambda b: (0, 0)),     # W_out[:, :D_in]
            pl.BlockSpec((Q, dim_out), lambda b: (0, 0)),        # hoisted query half
        ],
        out_specs=(
            pl.BlockSpec((NB, Q, dim_out), lambda b: (b, 0, 0)),
            pl.BlockSpec((NB, Q, L), lambda b: (b, 0, 0)),
        ),
        compiler_params=pltpu.CompilerParams(
            dimension_semantics=("parallel",),
            vmem_limit_bytes=_VMEM_LIMIT_BYTES),
        cost_estimate=cost,
    )(context, q_proj, w_out_mix, out_q)

    # (N, Q, D_out) -> (N, D_out, Q) -> (N, D_out, H, W): one tiny XLA transpose,
    # then a free contiguous reshape.  norm_layer is None (normalization='none').
    attn_map = jnp.transpose(out_qd, (0, 2, 1)).reshape(N, dim_out, H, W)
    return attn_map, attn_weights


def _reference_forward(context, query_param, w_in, w_out, num_query, dim_out):
    """Pure-JAX reference reproducing the PyTorch semantics, for sanity check."""
    N, L, D_in = context.shape
    q = jnp.broadcast_to(query_param, (N, num_query, D_in))
    q = jnp.einsum('nqd,ed->nqe', q, w_in)                          # linear_in
    scores = jnp.einsum('nqd,nld->nql', q, context)
    weights = jax.nn.softmax(scores, axis=-1)
    mix = jnp.einsum('nql,nld->nqd', weights, context)
    combined = jnp.concatenate([mix, q], axis=-1)
    out = jnp.tanh(jnp.einsum('nqc,oc->nqo', combined, w_out))
    H = W = int(round(num_query ** 0.5))
    return jnp.transpose(out, (0, 2, 1)).reshape(N, dim_out, H, W), weights


if __name__ == "__main__":
    # small shapes consistent with the module
    N, L = 2, 8
    D_IN, D_OUT = 32, 32
    NUM_QUERY = 16   # H = W = 4

    key = jax.random.PRNGKey(0)
    k_ctx, k_q, k_win, k_wout = jax.random.split(key, 4)

    context = jax.random.normal(k_ctx, (N, L, D_IN), dtype=jnp.float32)
    # deterministic parameter init (shapes from the module's __init__)
    query_param = jax.random.normal(k_q, (1, NUM_QUERY, D_IN), dtype=jnp.float32)
    w_in = jax.random.normal(k_win, (D_IN, D_IN), dtype=jnp.float32) * 0.1
    w_out = jax.random.normal(k_wout, (D_OUT, 2 * D_IN), dtype=jnp.float32) * 0.1

    attn_map, attn_weights = attn_layer_forward(
        context, query_param, w_in, w_out, NUM_QUERY, D_OUT)
    attn_map = jax.block_until_ready(attn_map)
    attn_weights = jax.block_until_ready(attn_weights)

    ref_map, ref_weights = _reference_forward(
        context, query_param, w_in, w_out, NUM_QUERY, D_OUT)

    assert attn_map.shape == (N, D_OUT, 4, 4)
    assert attn_weights.shape == (N, NUM_QUERY, L)
    # Tolerance accounts for the approx (EUP) reciprocal in the softmax normalization.
    assert jnp.allclose(attn_map, ref_map, atol=2e-3, rtol=2e-3)
    assert jnp.allclose(attn_weights, ref_weights, atol=2e-3, rtol=2e-3)

    print("KERNEL_OK")
</pallas_src>

<mosaic_0001>
module attributes {stable_mosaic.version = 11 : i64} {
  func.func @attn_layer_kernel(%arg0: i32, %arg1: memref<1x8x32xf32, #tpu.memory_space<vmem>>, %arg2: memref<16x32xf32, #tpu.memory_space<vmem>>, %arg3: memref<32x32xf32, #tpu.memory_space<vmem>>, %arg4: memref<16x32xf32, #tpu.memory_space<vmem>>, %arg5: memref<1x16x32xf32, #tpu.memory_space<vmem>>, %arg6: memref<1x16x8xf32, #tpu.memory_space<vmem>>) attributes {dimension_semantics = [#tpu.dimension_semantics<parallel>], iteration_bounds = array<i64: 2>, scalar_prefetch = 0 : i64, scratch_operands = 0 : i64, tpu.core_type = #tpu.core_type<tc>, window_params = [{transform_indices = @transform_0, window_bounds = array<i64: 1, 8, 32>}, {pipeline_mode = #tpu.pipeline_mode<synchronous>, transform_indices = @transform_1, window_bounds = array<i64: 16, 32>}, {pipeline_mode = #tpu.pipeline_mode<synchronous>, transform_indices = @transform_2, window_bounds = array<i64: 32, 32>}, {pipeline_mode = #tpu.pipeline_mode<synchronous>, transform_indices = @transform_3, window_bounds = array<i64: 16, 32>}, {transform_indices = @transform_4, window_bounds = array<i64: 1, 16, 32>}, {transform_indices = @transform_5, window_bounds = array<i64: 1, 16, 8>}]} {
    %c0 = arith.constant 0 : index
    %c0_0 = arith.constant 0 : index
    %c0_1 = arith.constant 0 : index
    %0 = vector.load %arg1[%c0, %c0_0, %c0_1] : memref<1x8x32xf32, #tpu.memory_space<vmem>>, vector<1x8x32xf32>
    %c0_2 = arith.constant 0 : index
    %c0_3 = arith.constant 0 : index
    %1 = vector.load %arg2[%c0_2, %c0_3] : memref<16x32xf32, #tpu.memory_space<vmem>>, vector<16x32xf32>
    %2 = vector.shape_cast %1 : vector<16x32xf32> to vector<1x16x32xf32>
    "tpu.trace_start"() <{level = 10 : i32, message = "bqd,bld->bql"}> : () -> ()
    %cst = arith.constant dense<0.000000e+00> : vector<1x16x8xf32>
    %3 = tpu.matmul %2, %0, %cst {dimension_numbers = #tpu.dot_dimension_numbers<[2], [2], [1], [1], [0, 0, 0, 1, 1, 1], [0], [0]>} : vector<1x16x32xf32>, vector<1x8x32xf32>, vector<1x16x8xf32> -> vector<1x16x8xf32>
    "tpu.trace_stop"() : () -> ()
    %cst_4 = arith.constant dense<0xFF800000> : vector<1x16xf32>
    %4 = vector.multi_reduction <maximumf>, %3, %cst_4 [2] : vector<1x16x8xf32> to vector<1x16xf32>
    %5 = vector.shape_cast %4 : vector<1x16xf32> to vector<1x16x1xf32>
    %6 = vector.broadcast %5 : vector<1x16x1xf32> to vector<1x16x8xf32>
    %7 = arith.subf %3, %6 : vector<1x16x8xf32>
    %8 = math.exp %7 : vector<1x16x8xf32>
    %cst_5 = arith.constant dense<0.000000e+00> : vector<1x16xf32>
    %9 = vector.multi_reduction <add>, %8, %cst_5 [2] : vector<1x16x8xf32> to vector<1x16xf32>
    %10 = vector.shape_cast %9 : vector<1x16xf32> to vector<1x16x1xf32>
    %11 = tpu.reciprocal %10 {approx = true} : vector<1x16x1xf32> -> vector<1x16x1xf32>
    %12 = vector.broadcast %11 : vector<1x16x1xf32> to vector<1x16x8xf32>
    %13 = arith.mulf %8, %12 : vector<1x16x8xf32>
    "tpu.trace_start"() <{level = 10 : i32, message = "bql,bld->bqd"}> : () -> ()
    %cst_6 = arith.constant dense<0.000000e+00> : vector<1x16x32xf32>
    %14 = tpu.matmul %13, %0, %cst_6 {dimension_numbers = #tpu.dot_dimension_numbers<[2], [1], [1], [2], [0, 0, 0, 1, 1, 2], [0], [0]>} : vector<1x16x8xf32>, vector<1x8x32xf32>, vector<1x16x32xf32> -> vector<1x16x32xf32>
    "tpu.trace_stop"() : () -> ()
    %15 = vector.shape_cast %14 : vector<1x16x32xf32> to vector<16x32xf32>
    %c0_7 = arith.constant 0 : index
    %c0_8 = arith.constant 0 : index
    %16 = vector.load %arg3[%c0_7, %c0_8] : memref<32x32xf32, #tpu.memory_space<vmem>>, vector<32x32xf32>
    %cst_9 = arith.constant dense<0.000000e+00> : vector<16x32xf32>
    %17 = tpu.matmul %15, %16, %cst_9 {dimension_numbers = #tpu.dot_dimension_numbers<[1], [1], [0], [0], [0, 0, 1, 0], [], []>} : vector<16x32xf32>, vector<32x32xf32>, vector<16x32xf32> -> vector<16x32xf32>
    %18 = vector.shape_cast %17 : vector<16x32xf32> to vector<1x16x32xf32>
    %c0_10 = arith.constant 0 : index
    %c0_11 = arith.constant 0 : index
    %19 = vector.load %arg4[%c0_10, %c0_11] : memref<16x32xf32, #tpu.memory_space<vmem>>, vector<16x32xf32>
    %20 = vector.shape_cast %19 : vector<16x32xf32> to vector<1x16x32xf32>
    %21 = arith.addf %18, %20 : vector<1x16x32xf32>
    %22 = math.tanh %21 : vector<1x16x32xf32>
    %c0_12 = arith.constant 0 : index
    %c0_13 = arith.constant 0 : index
    %c0_14 = arith.constant 0 : index
    %23 = vector.load %arg5[%c0_12, %c0_13, %c0_14] : memref<1x16x32xf32, #tpu.memory_space<vmem>>, vector<1x16x32xf32>
    tpu.vector_store %arg5[%c0_12, %c0_13, %c0_14], %22 {strides = array<i32>} : memref<1x16x32xf32, #tpu.memory_space<vmem>>, vector<1x16x32xf32>,
    %c0_15 = arith.constant 0 : index
    %c0_16 = arith.constant 0 : index
    %c0_17 = arith.constant 0 : index
    %24 = vector.load %arg6[%c0_15, %c0_16, %c0_17] : memref<1x16x8xf32, #tpu.memory_space<vmem>>, vector<1x16x8xf32>
    tpu.vector_store %arg6[%c0_15, %c0_16, %c0_17], %13 {strides = array<i32>} : memref<1x16x8xf32, #tpu.memory_space<vmem>>, vector<1x16x8xf32>,
    return
  }
  func.func @transform_0(%arg0: i32) -> (i32, i32, i32) {
    %c0_i32 = arith.constant 0 : i32
    %c0_i32_0 = arith.constant 0 : i32
    %c0_i32_1 = arith.constant 0 : i32
    return %arg0, %c0_i32, %c0_i32_0 : i32, i32, i32
  }
  func.func @transform_1(%arg0: i32) -> (i32, i32) {
    %c0_i32 = arith.constant 0 : i32
    %c0_i32_0 = arith.constant 0 : i32
    %c0_i32_1 = arith.constant 0 : i32
    return %c0_i32, %c0_i32_0 : i32, i32
  }
  func.func @transform_2(%arg0: i32) -> (i32, i32) {
    %c0_i32 = arith.constant 0 : i32
    %c0_i32_0 = arith.constant 0 : i32
    %c0_i32_1 = arith.constant 0 : i32
    return %c0_i32, %c0_i32_0 : i32, i32
  }
  func.func @transform_3(%arg0: i32) -> (i32, i32) {
    %c0_i32 = arith.constant 0 : i32
    %c0_i32_0 = arith.constant 0 : i32
    %c0_i32_1 = arith.constant 0 : i32
    return %c0_i32, %c0_i32_0 : i32, i32
  }
  func.func @transform_4(%arg0: i32) -> (i32, i32, i32) {
    %c0_i32 = arith.constant 0 : i32
    %c0_i32_0 = arith.constant 0 : i32
    %c0_i32_1 = arith.constant 0 : i32
    return %arg0, %c0_i32, %c0_i32_0 : i32, i32, i32
  }
  func.func @transform_5(%arg0: i32) -> (i32, i32, i32) {
    %c0_i32 = arith.constant 0 : i32
    %c0_i32_0 = arith.constant 0 : i32
    %c0_i32_1 = arith.constant 0 : i32
    return %arg0, %c0_i32, %c0_i32_0 : i32, i32, i32
  }
}

</mosaic_0001>

<bundles_post_ra>
// kernel: tpu_custom_call.1
= control target key start
LH: loop header
LB: loop body
LE: loop exit
PB: predicated region body
PF: predicated region fallthrough
CT: control target
= control target key end

     0   :  { %11 = vsyncpa [#allocation3], 0  ;;  %s1435_s0 = inlined_call_operand.hbm [shape: f32[2,8,32], index: 0, kind: input, shape index: {}]   ;;  %s1436_s1 = inlined_call_operand.hbm [shape: f32[16,32], index: 1, kind: input, shape index: {}]   ;;  %s1437_s2 = inlined_call_operand.hbm [shape: f32[32,32], index: 2, kind: input, shape index: {}]   ;;  %s1438_s3 = inlined_call_operand.hbm [shape: f32[16,32], index: 3, kind: input, shape index: {}]   ;;  %s1439_s4 = inlined_call_operand.hbm [shape: f32[2,16,32], index: 4, kind: output, shape index: {0}]   ;;  %s1440_s5 = inlined_call_operand.vmem [shape: f32[2,16,8], index: 5, kind: output, shape index: {1}]  }
   0x1   :  { %13 = vsyncpa [#allocation3 + $0x1], 0 }
   0x2   :  { %14 = vsyncpa [#allocation6], 0 }
   0x3   :  { %15 = vsyncpa [#allocation9], 0 }
   0x4   :  { %16 = vsyncpa [#allocation4], 0 }
   0x5   :  { %18 = vsyncpa [#allocation4 + $0x1], 0  ;;  %s1146_s18 = smov 0   ;;  %s1148_s19 = smov 0  }
   0x6   :  { %s1150_s20 = smov 0   ;;  %s1152_s21 = smov 0  }
   0x7 LB: > { %s1167_s22 = sadd.s32 4294967295, %s1105_s21   ;;  %s745_s23 = sadd.s32 4294967294, %s1105_s21   ;;  %s1105_s21 = sphi %s1152_s21, %s1463_s21   ;;  %s1101_s20 = sphi %s1150_s20, %s1462_s20   ;;  %s1097_s19 = sphi %s1148_s19, %s1461_s19   ;;  %s1093_s18 = sphi %s1146_s18, %s1460_s18  }
   0x8   : > { %p44_p0 = scmp.ne.s32.totalorder %s1097_s19, %s1093_s18  ;;  %p1441_p1 = scmp.eq.s32.totalorder %s1167_s22, 0 }
   0x9   : > { %p137_p3 = scmp.eq.s32.totalorder %s745_s23, 1  ;;  %p746_p5 = scmp.ge.s32.totalorder %s1105_s21, 1 }
   0xa   : > { %p1176_p4 = por %p1441_p1, %p44_p0  ;;  %p170_p7 = scmp.lt.s32.totalorder %s1105_s21, 3 }
   0xb   : > { %p1181_p6 = por %p137_p3, %p44_p0  ;;  %s1107_s27 = smov [#allocation5]  }
   0xc   : > { %s1444_s24 = scalar_select %p1176_p4, 1, 0 }
   0xd   : > { %s1445_s25 = scalar_select %p1181_p6, 1, 0 }
   0xe   : > { %p1186_p8 = pnand %p746_p5, %p170_p7  ;;  %s182_s28 = sshll.u32 %s1107_s27, 4  ;;  %s1190_s28 = int_to_ptr.vmem [resolvable:$true] %s182_s28 }
   0xf   : > { %s1108_s30 = smov [#allocation7]   ;;  %s1109_s7 = smov [#allocation8]  }
  0x10   : > { %s1446_s26 = scalar_select %p1186_p8, 1, 0 }
  0x11   : > { %p840_p9 = pneg %p1186_p8  ;;  %s195_s6 = sshll.u32 %s1108_s30, 4  ;;  %s1201_s6 = int_to_ptr.vmem [resolvable:$true] %s195_s6 }
  0x12   : > { %s1203_s8 = sshll.u32 %s1109_s7, 4  ;;  %s917_s11 = scalar_lea.hbm %s1436_s1, 256  ;;  %s209_s8 = int_to_ptr.vmem [resolvable:$true] %s1203_s8 }
  0x13   : > { %p1197_p11 = pnand %p840_p9, %p1441_p1  ;;  %p918_p12 = scmp.ne.s32.totalorder %s1436_s1, %s917_s11 }
  0x14   : > { %p924_p5 = scmp.lt.u32.totalorder %s917_s11, %s1436_s1 }
  0x15   : > { %p1213_p13 = pneg %p1197_p11 }
  0x17   : > { %p920_p0 = pnand %p1213_p13, %p918_p12 }
  0x19   : > { %p921_p3 = pneg %p920_p0 }
  0x1b   : > { %p926_p7 = pnand %p924_p5, %p921_p3 }
  0x1d   : > { %929 = shalt.err (!%p926_p7)
}
  0x1e   : > { %s930_s17 = scalar_lea.vmem %s1190_s28, 256  ;;  %p938_p2 = scmp.lt.s32.totalorder %s1190_s28, %s1190_s28 }
  0x1f   : > { %p931_p9 = scmp.ne.s32.totalorder %s1190_s28, %s930_s17  ;;  %p939_p6 = scmp.lt.s32.totalorder %s930_s17, %s930_s17 }
  0x21   : > { %p933_p10 = pnand %p931_p9, %p1213_p13  ;;  %p940_p12 = por %p939_p6, %p938_p2 }
  0x23   : > { %p934_p1 = pneg %p933_p10 }
  0x25   : > { %p941_p0 = pnand %p940_p12, %p934_p1 }
  0x27   : > { %944 = shalt.err (!%p941_p0)
}
  0x28   : > { %s1110_s23 = smov 128   ;;  %s1111_s27 = smov 8  }
  0x29   : > { %843 = dma.hbm_to_vmem [thread:$0]  (!%p1197_p11), %s1436_s1, 256, %s1190_s28, [#allocation6], %s1110_s23, %s1110_s23, %s1111_s27  }
  0x2a   : > { %s945_s11 = scalar_lea.hbm %s1437_s2, 512 }
  0x2b   : > { %p946_p1 = scmp.ne.s32.totalorder %s1437_s2, %s945_s11  ;;  %p952_p10 = scmp.lt.u32.totalorder %s945_s11, %s1437_s2 }
  0x2d   : > { %p948_p2 = pnand %p946_p1, %p1213_p13 }
  0x2f   : > { %p949_p6 = pneg %p948_p2 }
  0x31   : > { %p954_p3 = pnand %p952_p10, %p949_p6 }
  0x33   : > { %957 = shalt.err (!%p954_p3)
}
  0x34   : > { %s958_s28 = scalar_lea.vmem %s1201_s6, 512  ;;  %p966_p12 = scmp.lt.s32.totalorder %s1201_s6, %s1201_s6 }
  0x35   : > { %p959_p5 = scmp.ne.s32.totalorder %s1201_s6, %s958_s28  ;;  %p967_p0 = scmp.lt.s32.totalorder %s958_s28, %s958_s28 }
  0x37   : > { %p961_p7 = pnand %p959_p5, %p1213_p13  ;;  %p968_p1 = por %p967_p0, %p966_p12 }
  0x39   : > { %p962_p9 = pneg %p961_p7 }
  0x3b   : > { %p969_p2 = pnand %p968_p1, %p962_p9 }
  0x3d   : > { %972 = shalt.err (!%p969_p2)
}
  0x3e   : > { %846 = dma.hbm_to_vmem [thread:$0]  (!%p1197_p11), %s1437_s2, 512, %s1201_s6, [#allocation6], %s1110_s23, %s1110_s23, %s1111_s27  }
  0x3f   : > { %s973_s10 = scalar_lea.hbm %s1438_s3, 256 }
  0x40   : > { %p974_p6 = scmp.ne.s32.totalorder %s1438_s3, %s973_s10  ;;  %p980_p5 = scmp.lt.u32.totalorder %s973_s10, %s1438_s3 }
  0x42   : > { %p976_p10 = pnand %p974_p6, %p1213_p13 }
  0x44   : > { %p977_p3 = pneg %p976_p10 }
  0x46   : > { %p982_p7 = pnand %p980_p5, %p977_p3 }
  0x48   : > { %985 = shalt.err (!%p982_p7)
}
  0x49   : > { %s986_s16 = scalar_lea.vmem %s209_s8, 256  ;;  %p994_p1 = scmp.lt.s32.totalorder %s209_s8, %s209_s8 }
  0x4a   : > { %p987_p9 = scmp.ne.s32.totalorder %s209_s8, %s986_s16  ;;  %p995_p2 = scmp.lt.s32.totalorder %s986_s16, %s986_s16 }
  0x4c   : > { %p989_p12 = pnand %p987_p9, %p1213_p13  ;;  %p996_p4 = por %p995_p2, %p994_p1 }
  0x4e   : > { %p990_p0 = pneg %p989_p12 }
  0x50   : > { %p997_p8 = pnand %p996_p4, %p990_p0 }
  0x52   : > { %1000 = shalt.err (!%p997_p8)
}
  0x53   : > { %849 = dma.hbm_to_vmem [thread:$0]  (!%p1197_p11), %s1438_s3, 256, %s209_s8, [#allocation9], %s1110_s23, %s1110_s23, %s1111_s27  }
  0x54   : > { %s1286_s14 = sadd.s32 1, %s1105_s21   ;;  %s31_s17 = sadd.s32 1, %s1101_s20 }
  0x55   : > { %s28_s29 = ssub.s32 %s1105_s21, %s1286_s14  ;;  %p38_p8 = scmp.ne.s32.totalorder %s1101_s20, %s1097_s19 }
  0x56   : > { %p29_p4 = scmp.eq.s32.totalorder %s28_s29, 0  ;;  %p39_p13 = scmp.eq.s32.totalorder %s1105_s21, 0 }
  0x57   : > { %p861_p6 = scmp.lt.s32.totalorder %s1105_s21, 2  ;;  %p1449_p3 = scmp.eq.s32.totalorder %s1167_s22, 1 }
  0x58   : > { %s1296_s30 = scalar_select %p29_p4, %s1101_s20, %s31_s17  }
  0x59   : > { %p40_p10 = por %p39_p13, %p38_p8  ;;  %p1300_p5 = por %p1449_p3, %p38_p8 }
  0x5a   : > { %s222_s9 = sand.u32 1, %s1101_s20   ;;  %s752_s10 = sshll.u32 %s1105_s21, 7 }
  0x5b   : > { %s751_s8 = sshll.u32 %s222_s9, 3  ;;  %s1309_s11 = scalar_lea.hbm %s1435_s0, %s752_s10 }
  0x5c   : > { %s226_s12 = scalar_lea.vmem [#allocation2], %s751_s8  ;;  %p1311_p11 = pnand %p861_p6, %p40_p10 }
  0x5d   : > { %s233_s13 = sshll.u32 %s226_s12, 4  ;;  %s223_s16 = scalar_lea.sflag [#allocation3], %s222_s9  ;;  %s1315_s13 = int_to_ptr.vmem [resolvable:$true] %s233_s13 }
  0x5e   : > { %s1001_s6 = scalar_lea.hbm %s1309_s11, 128  ;;  %p1003_p9 = pneg %p1311_p11 }
  0x5f   : > { %p1002_p7 = scmp.ne.s32.totalorder %s1309_s11, %s1001_s6  ;;  %s1006_s17 = scalar_lea.hbm %s1435_s0, 256 }
  0x60   : > { %p1007_p1 = scmp.lt.u32.totalorder %s1309_s11, %s1435_s0  ;;  %p1008_p2 = scmp.lt.u32.totalorder %s1006_s17, %s1001_s6 }
  0x61   : > { %p1004_p12 = pnand %p1003_p9, %p1002_p7  ;;  %p1010_p8 = scmp.lt.u32.totalorder %s1001_s6, %s1309_s11 }
  0x62   : > { %p1009_p4 = por %p1008_p2, %p1007_p1 }
  0x63   : > { %p1005_p0 = pneg %p1004_p12 }
  0x64   : > { %p1011_p13 = por %p1010_p8, %p1009_p4 }
  0x66   : > { %p1012_p6 = pnand %p1011_p13, %p1005_p0 }
  0x68   : > { %1015 = shalt.err (!%p1012_p6)
}
  0x69   : > { %s1016_s9 = scalar_lea.vmem %s1315_s13, 128  ;;  %s1112_s23 = smov [#allocation2]  }
  0x6a   : > { %p1017_p10 = scmp.ne.s32.totalorder %s1315_s13, %s1016_s9  ;;  %s1021_s27 = sshll.u32 %s1112_s23, 4  ;;  %s1022_s27 = int_to_ptr.vmem [resolvable:$false] %s1021_s27 }
  0x6b   : > { %s1023_s12 = scalar_lea.vmem %s1022_s27, 256  ;;  %p1024_p12 = scmp.lt.s32.totalorder %s1315_s13, %s1022_s27 }
  0x6c   : > { %p1019_p3 = pnand %p1017_p10, %p1003_p9  ;;  %p1025_p1 = scmp.lt.s32.totalorder %s1023_s12, %s1016_s9 }
  0x6e   : > { %p1020_p7 = pneg %p1019_p3  ;;  %p1026_p2 = por %p1025_p1, %p1024_p12 }
  0x70   : > { %p1027_p4 = pnand %p1026_p2, %p1020_p7 }
  0x72   : > { %1030 = shalt.err (!%p1027_p4)
}
  0x73   : > { %853 = dma.hbm_to_vmem [thread:$0]  (!%p1311_p11), %s1309_s11, 128, %s1315_s13, %s223_s16  }
  0x74   : > { %p1452_p0 = scmp.ne.s32.totalorder %s1446_s26, 0 }
  0x75   : > { %s1345_s6 = sand.u32 (!%p1452_p0), 1, %s1097_s19   ;;  %p1453_p9 = scmp.ne.s32.totalorder (!%p1452_p0), %s1444_s24, 0 }
  0x76   : > { %242 = sbr.rel (%p1452_p0) target bundleno = 1123 (0x463), region = 36  ;;  %s754_s28 = sshll.u32 (!%p1452_p0), %s1345_s6, 3 }
  0x77   : > { %s245_s29 = scalar_lea.sflag (!%p1452_p0), [#allocation3], %s1345_s6  ;;  %s248_s17 = scalar_lea.vmem (!%p1452_p0), [#allocation2], %s754_s28 }
  0x7d   : > { %1076 = dma.done.wait (%p1453_p9), %s245_s29, 128  }
  0x7e   : > { %1078 = vsyncadd (%p1453_p9), %s245_s29, 4294967168  ;;  %p1454_p8 = scmp.eq.s32.totalorder %s1167_s22, 0 }
  0x80   : > { %1080 = dma.done.wait (%p1454_p8), [#allocation6], 768   ;;  %p1455_p11 = pmov %p1454_p8 }
  0x81   : > { %p1456_p13 = pmov %p1454_p8 }
  0x82   : > { %1082 = vsyncadd (%p1455_p11), [#allocation6], 4294966528 }
  0x83   : > { %1084 = dma.done.wait (%p1456_p13), [#allocation9], 256   ;;  %p1457_p6 = pmov %p1454_p8 }
  0x84   : > { %vm300_vm0 = vcmask 261120   ;;  %v297_v0 = vld [vmem:[%s248_s17] sm:$0xff]  ;;  %v298_v1 = vld [vmem:[#allocation5] sm:$0xff]  ;;  %v299_v2 = vld [vmem:[#allocation5 + $0x8] sm:$0xff]  ;;  %vm385_vm1 = vcmask 64512   ;;  %p292_p10 = scmp.lt.s32.totalorder %s1167_s22, 1 }
  0x85   : > { %1086 = vsyncadd (%p1457_p6), [#allocation9], 4294967040  ;;  %791 = vmatprep.subr.msk.mxu0 %vm300_vm0, %v297_v0  ;;  %793 = vmatprep.mubr.msk.f32.mxu0 %vm300_vm0, %v298_v1  ;;  %v489_v17 = vld [vmem:[#allocation7] sm:$0xff]  ;;  %v490_v18 = vld [vmem:[#allocation7 + $0x8] sm:$0xff]  ;;  %s758_s16 = sshll.u32 %s1345_s6, 4  ;;  %s778_s10 = sshll.u32 %s1167_s22, 8 }
  0x86   : > { %792 = vmatpush3.xpose.msk.msra.mxu0 %vm300_vm0, %v297_v0  ;;  %vm813_vm2 = vmpackc.low %vm300_vm0, %vm300_vm0  ;;  %v812_v19 = vpack.c.bf16 %v490_v18, %v489_v17  ;;  %v491_v20 = vld [vmem:[#allocation7 + $0x10] sm:$0xff]  ;;  %v492_v21 = vld [vmem:[#allocation7 + $0x18] sm:$0xff]  ;;  %s293_s24 = scalar_select %p292_p10, %s1167_s22, 1 }
  0x87   : > { %796 = vmatprep.subr.mxu0 %v297_v0  ;;  %v818_v22 = vpack.c.bf16 %v492_v21, %v491_v20  ;;  %v587_v31 = vld [vmem:[#allocation8 + $0x8] sm:$0xff]  ;;  %v586_v32 = vld [vmem:[#allocation8] sm:$0xff]  ;;  %s284_s8 = scalar_lea.vmem [#allocation10], %s758_s16  ;;  %s1387_s12 = scalar_lea.hbm %s1439_s4, %s778_s10 }
  0x88   : > { %814 = vmatprep.subr.msk.bf16.mxu1 %vm813_vm2, %v812_v19  ;;  %s777_s26 = sshll.u32 %s293_s24, 4  ;;  %s615_s9 = sshll.u32 %s284_s8, 4  ;;  %s1389_s9 = int_to_ptr.vmem [resolvable:$true] %s615_s9 }
  0x89   : > { %794 = vmatmul.mubr.msk.f32.vlgmr.msra.gmra.mrb[0].mxu0 %vm300_vm0, %v299_v2  ;;  %817 = vmatpush3.bf16.xpose.msk.msra.mxu1 %vm813_vm2, %v812_v19  ;;  %s296_s15 = scalar_lea.vmem %s1440_s5, %s777_s26  ;;  %s597_s28 = scalar_lea.sflag [#allocation4], %s1345_s6 }
  0x8a   : > { %797 = vmatpush3.msra.mxu0 %v297_v0  ;;  %820 = vmatprep.subr.msk.bf16.mxu1 %vm813_vm2, %v818_v22  ;;  %s1031_s22 = scalar_lea.vmem %s1389_s9, 256  ;;  %s1113_s29 = smov [#allocation10]  }
  0x8b   : > { %p1032_p3 = scmp.ne.s32.totalorder %s1389_s9, %s1031_s22  ;;  %s1035_s17 = sshll.u32 %s1113_s29, 4  ;;  %s1036_s17 = int_to_ptr.vmem [resolvable:$false] %s1035_s17 }
  0x8c   : > { %s1037_s24 = scalar_lea.vmem %s1036_s17, 512  ;;  %p1038_p1 = scmp.lt.s32.totalorder %s1389_s9, %s1036_s17 }
  0x8d   : > { %p1033_p7 = pnand %p1032_p3, %p1300_p5  ;;  %p1039_p2 = scmp.lt.s32.totalorder %s1037_s24, %s1031_s22 }
  0x8f   : > { %p1034_p12 = pneg %p1033_p7  ;;  %p1040_p4 = por %p1039_p2, %p1038_p1 }
  0x91   : > { %823 = vmatpush3.bf16.xpose.msk.msra.mxu1 %vm813_vm2, %v818_v22  ;;  %p1041_p0 = pnand %p1040_p4, %p1034_p12 }
 0x15c   : > { %v795_v3 = vpop.f32.mrb[0].mxu0 }
 0x15d   : > { %v376_v4 = vpop.f32.mrb[1].mxu0  ;;  %v389_v6 = vsel %vm385_vm1, %v795_v3, -inf }
 0x15e   : > { %v386_v5 = vsel %vm385_vm1, %v376_v4, -inf }
 0x15f   : > { %387 = vmax.xlane.f32.xlu0 %v386_v5 }
 0x163   : > { %390 = vmax.xlane.f32.xlu0 %v389_v6 }
 0x1ec   : > { %v388_v7 = vpop.xlane.xlu0 %387 }
 0x1ed   : > { %v392_v8 = vsub.f32 %v376_v4, %v388_v7 }
 0x1ef   : > { %v394_v9 = vmul.f32 1.442695, %v392_v8 }
 0x1f0   : > { %v391_v10 = vpop.xlane.xlu0 %390 }
 0x1f1   : > { %905 = vpow2.f32 %v394_v9  ;;  %v393_v11 = vsub.f32 %v795_v3, %v391_v10 }
 0x1f3   : > { %v396_v12 = vmul.f32 1.442695, %v393_v11 }
 0x1f5   : > { %907 = vpow2.f32 %v396_v12 }
 0x1fb   : > { %v906_v13 = vpop.eup %905 }
 0x1fc   : > { %v398_v14 = vsel %vm385_vm1, %v906_v13, 0.0 }
 0x1fd   : > { %399 = vadd.xlane.f32.xlu1 %v398_v14 }
 0x1ff   : > { %v908_v15 = vpop.eup %907 }
 0x200   : > { %v401_v16 = vsel %vm385_vm1, %v908_v15, 0.0 }
 0x201   : > { %402 = vadd.xlane.f32.xlu1 %v401_v16 }
 0x28a   : > { %v400_v23 = vpop.xlane.xlu1 %399 }
 0x28b   : > { %909 = vrcp.f32 %v400_v23 }
 0x28e   : > { %v403_v24 = vpop.xlane.xlu1 %402 }
 0x28f   : > { %911 = vrcp.f32 %v403_v24 }
 0x295   : > { %v910_v25 = vpop.eup %909 }
 0x296   : > { %v406_v26 = vmul.f32 %v910_v25, %v906_v13 }
 0x298   : > { %798 = vmatprep.mubr.msk.f32.mxu0 %vm385_vm1, %v406_v26  ;;  %594 = vst.msk [vmem:[%s296_s15] sm:$0xff] %vm385_vm1, %v406_v26 }
 0x299   : > { %v912_v27 = vpop.eup %911 }
 0x29a   : > { %v407_v28 = vmul.f32 %v912_v27, %v908_v15 }
 0x29c   : > { %595 = vst.msk [vmem:[%s296_s15 + $0x8] sm:$0xff] %vm385_vm1, %v407_v28  ;;  %799 = vmatmul.mubr.msk.f32.vlgmr.msra.gmra.mrb[2].mxu0 %vm385_vm1, %v407_v28 }
 0x36f   : > { %v800_v29 = vpop.f32.mrb[2].mxu0 }
 0x370   : > { %v480_v30 = vpop.f32.mrb[3].mxu0 }
 0x371   : > { %809 = vmatprep.mubr.msk.f32.mxu1 %vm300_vm0, %v480_v30 }
 0x372   : > { %810 = vmatmul.mubr.msk.f32.vlgmr.msra.gmra.mrb[0].mxu1 %vm300_vm0, %v800_v29 }
 0x445   : > { %v811_v33 = vpop.f32.mrb[0].mxu1 }
 0x446   : > { %v589_v34 = vadd.f32 %v811_v33, %v587_v31  ;;  %v577_v35 = vpop.f32.mrb[1].mxu1 }
 0x447   : > { %v588_v36 = vadd.f32 %v586_v32, %v577_v35 }
 0x448   : > { %913 = vtanh.f32 %v589_v34 }
 0x449   : > { %915 = vtanh.f32 %v588_v36 }
 0x452   : > { %v914_v37 = vpop.eup %913 }
 0x453   : > { %v916_v38 = vpop.eup %915  ;;  %593 = vst.msk [vmem:[%s284_s8 + $0x8] sm:$0xff] %vm300_vm0, %v914_v37 }
 0x454   : > { %592 = vst.msk [vmem:[%s284_s8] sm:$0xff] %vm300_vm0, %v916_v38 }
 0x455   : > { %1044 = shalt.err (!%p1041_p0)
}
 0x456   : > { %s1045_s26 = scalar_lea.hbm %s1387_s12, 256  ;;  %s1049_s15 = scalar_lea.hbm %s1439_s4, 512 }
 0x457   : > { %p1046_p9 = scmp.ne.s32.totalorder %s1387_s12, %s1045_s26  ;;  %p1050_p13 = scmp.lt.u32.totalorder %s1387_s12, %s1439_s4 }
 0x458   : > { %p1051_p6 = scmp.lt.u32.totalorder %s1049_s15, %s1045_s26  ;;  %p1053_p3 = scmp.lt.u32.totalorder %s1045_s26, %s1387_s12 }
 0x459   : > { %p1047_p8 = pnand %p1046_p9, %p1300_p5 }
 0x45a   : > { %p1052_p10 = por %p1051_p6, %p1050_p13 }
 0x45b   : > { %p1048_p11 = pneg %p1047_p8 }
 0x45c   : > { %p1054_p7 = por %p1053_p3, %p1052_p10 }
 0x45e   : > { %p1055_p12 = pnand %p1054_p7, %p1048_p11 }
 0x460   : > { %1058 = shalt.err (!%p1055_p12)
}
 0x461   : > { %s1114_s8 = smov 128   ;;  %s1115_s23 = smov 8  }
 0x462   : > { %838 = dma.vmem_to_hbm [thread:$0]  (%p1300_p5), %s1389_s9, 256, %s1387_s12, %s597_s28, %s1114_s8, %s1114_s8, %s1115_s23  }
 0x463 PF: > { %s633_s27 = sand.u32 1, %s1093_s18   ;;  %p1458_p1 = scmp.ne.s32.totalorder %s1445_s25, 0 }
 0x464   : > { %p1459_p2 = scmp.ge.s32.totalorder %s1105_s21, 2  ;;  %s634_s22 = scalar_lea.sflag [#allocation4], %s633_s27 }
 0x466   : > { %p855_p4 = pnand %p1459_p2, %p1458_p1 }
 0x468   : > { %1088 = dma.done.wait (!%p855_p4), %s634_s22, 256  }
 0x469   : > { %1090 = vsyncadd (!%p855_p4), %s634_s22, 4294967040  ;;  %p21_p0 = scmp.ge.s32.totalorder %s1286_s14, 4   ;;  %s1460_s18 = smov %s1097_s19 }
 0x46a   : > { %s1461_s19 = smov %s1101_s20  ;;  %s1462_s20 = smov %s1296_s30 }
 0x46b   : > { %s1463_s21 = smov %s1286_s14  ;;  %23 = sbr.rel (!%p21_p0) target bundleno = 7 (0x7), region = 105 }
 0x472   :  { %647 = vsyncpa [#allocation3], 1 }
 0x473   :  { %649 = vsyncpa [#allocation3 + $0x1], 1 }
 0x474   :  { %650 = vsyncpa [#allocation6], 1 }
 0x475   :  { %651 = vsyncpa [#allocation9], 1 }
 0x476   :  { %652 = vsyncpa [#allocation4], 1 }
 0x477   :  { %654 = vsyncpa [#allocation4 + $0x1], 1 }

</bundles_post_ra>
